<compile_context>
chip_gen: v6e
topology: v6e:2x2x1
jax: 0.10.0
libtpu: 0.0.40
codegen_flags: <defaults>
</compile_context>

<pallas_src>
import functools

import jax
import jax.numpy as jnp
from jax import lax
from jax.experimental import pallas as pl
from jax.experimental.pallas import tpu as pltpu


def _conv_as_matmul_kernel(p_ref, w_ref, o_ref):
    # p_ref : (K, TM)      K = 9*Cin im2col rows for TM output pixels
    # w_ref : (Cout, K)    resident filter matrix (fetched once)
    # o_ref : (Cout, TM)   channel-major output tile, lane-dense along TM
    o_ref[...] = jnp.dot(
        w_ref[...], p_ref[...], preferred_element_type=jnp.float32
    ).astype(o_ref.dtype)


def _round_up(x, m):
    return -(-x // m) * m


def _padded_tile_bytes(rows, cols, dtype):
    """VMEM footprint of a (rows, cols) tile including sublane/lane padding."""
    itemsize = jnp.dtype(dtype).itemsize
    sublane = max(8, 32 // itemsize)          # 8 for f32, 16 for bf16
    return _round_up(rows, sublane) * _round_up(cols, 128) * itemsize


def _pick_tm(hw, per_pixel_vmem_bytes, max_tm):
    """Pixel-tile size: as large as possible (amortize ~0.35us/grid-step), a
    multiple of 128 (lane-dense output stores), a divisor of H*W (no pixel
    padding -> free final reshape), and small enough that the double-buffered
    working set fits comfortably in VMEM on every TPU generation."""
    budget = 24 << 20                         # double-buffered working-set target
    cap = max(128, (budget // max(per_pixel_vmem_bytes, 1)) // 128 * 128)
    cap = min(cap, max_tm)
    best = None
    t = 128
    while t <= min(hw, cap):
        if hw % t == 0:
            best = t
        t += 128
    if best is not None:
        return best, hw
    if hw <= cap:                             # full-extent block: always legal
        return hw, hw
    # TODO(synk): odd H*W larger than the tile cap -> pad the pixel axis and
    # slice the result afterwards (one extra output pass in this rare case).
    hw_pad = _round_up(hw, cap)
    return cap, hw_pad


def overlap_patch_embed(x_nchw, weight_oihw, *, compute_dtype=jnp.bfloat16,
                        out_dtype=None, max_tm=16384):
    """Equivalent of OverlapPatchEmbed.forward (Conv2d 3x3, stride 1, pad 1, no bias).

    x_nchw:      [B, Cin, H, W]     (PyTorch NCHW convention)
    weight_oihw: [Cout, Cin, 3, 3]  (PyTorch Conv2d weight convention)
    compute_dtype: matmul operand dtype (default bf16; accumulation is f32).
                   Pass jnp.float32 to keep f32 operands.
    out_dtype:   output dtype (default: x's dtype).
    returns:     [B, Cout, H, W]
    """
    B, Cin, H, W = x_nchw.shape
    Cout = weight_oihw.shape[0]
    if out_dtype is None:
        out_dtype = x_nchw.dtype
    if compute_dtype is None:
        compute_dtype = x_nchw.dtype
    K = 9 * Cin
    HW = H * W

    # ---- wrapper-side im2col, K-major, from the padded NCHW input ----
    x_c = x_nchw.astype(compute_dtype)
    x_pad = jnp.pad(x_c, ((0, 0), (0, 0), (1, 1), (1, 1)))       # [B,Cin,H+2,W+2]
    taps = [x_pad[:, :, dy:dy + H, dx:dx + W]
            for dy in range(3) for dx in range(3)]
    cols = jnp.concatenate(taps, axis=1).reshape(B, K, HW)        # [B, 9Cin, H*W]

    # Weight OIHW -> [Cout, (ky, kx, Cin)] matching the tap/channel order above.
    w_mat = jnp.transpose(weight_oihw, (0, 2, 3, 1)).reshape(Cout, K)
    w_mat = w_mat.astype(compute_dtype)

    # ---- pixel-axis tiling ----
    cdt_i = jnp.dtype(compute_dtype).itemsize
    out_i = jnp.dtype(out_dtype).itemsize
    k_sub = _round_up(K, max(8, 32 // cdt_i))
    c_sub = _round_up(Cout, max(8, 32 // out_i))
    per_pixel = 2 * (k_sub * cdt_i + c_sub * out_i)   # double-buffered LHS + out
    tm, hw_pad = _pick_tm(HW, per_pixel, max_tm)

    n_m = hw_pad // tm
    # v7x megacore: keep the total grid-step count even when it is cheap.
    if (B * n_m) % 2 == 1 and tm % 256 == 0:
        tm //= 2
        n_m *= 2

    if hw_pad != HW:
        cols = jnp.pad(cols, ((0, 0), (0, 0), (0, hw_pad - HW)))

    # ---- explicit VMEM budget from padded tile shapes; chip-aware cap ----
    need = 2 * (_padded_tile_bytes(K, tm, compute_dtype)
                + _padded_tile_bytes(Cout, tm, out_dtype)
                + _padded_tile_bytes(Cout, K, compute_dtype))
    try:
        vmem_cap = int(pltpu.get_tpu_info().vmem_capacity_bytes) * 3 // 4
    except Exception:
        vmem_cap = 48 << 20       # safe on v5e/v6e (128 MiB) and v7x (64 MiB)
    vmem_limit = int(min(max(2 * need, 8 << 20), vmem_cap))

    out = pl.pallas_call(
        _conv_as_matmul_kernel,
        out_shape=jax.ShapeDtypeStruct((B, Cout, hw_pad), out_dtype),
        grid_spec=pltpu.PrefetchScalarGridSpec(
            num_scalar_prefetch=0,
            grid=(B, n_m),
            in_specs=[
                pl.BlockSpec((None, K, tm), lambda b, i: (b, 0, i)),
                pl.BlockSpec((Cout, K), lambda b, i: (0, 0)),    # resident weight
            ],
            out_specs=pl.BlockSpec((None, Cout, tm), lambda b, i: (b, 0, i)),
        ),
        compiler_params=pltpu.CompilerParams(
            dimension_semantics=("parallel", "parallel"),
            vmem_limit_bytes=vmem_limit,
        ),
    )(cols, w_mat)

    if hw_pad != HW:
        out = out[:, :, :HW]
    return out.reshape(B, Cout, H, W)                 # free: already channel-major


if __name__ == "__main__":
    # Small, deterministic example shapes consistent with the module.
    B, Cin, H, W = 2, 4, 16, 16
    Cout = 32  # embed_dim

    key = jax.random.PRNGKey(0)
    kx, kw = jax.random.split(key)
    x = jax.random.normal(kx, (B, Cin, H, W), dtype=jnp.float32)
    fan_in = Cin * 3 * 3
    weight = jax.random.normal(kw, (Cout, Cin, 3, 3), dtype=jnp.float32) / jnp.sqrt(fan_in)

    fwd = jax.jit(overlap_patch_embed)
    out = jax.block_until_ready(fwd(x, weight))
    assert out.shape == (B, Cout, H, W)
    assert out.dtype == x.dtype

    # Reference: XLA conv (same semantics as nn.Conv2d, stride 1, pad 1, no bias).
    ref = lax.conv_general_dilated(
        x, weight, window_strides=(1, 1), padding=((1, 1), (1, 1)),
        dimension_numbers=("NCHW", "OIHW", "NCHW"))

    # Default path uses bf16 operands (f32 accumulation): bf16-level tolerance.
    assert jnp.allclose(out, ref, atol=5e-2, rtol=5e-2)

    # f32-operand path (MXU precision left at Mosaic default, so tolerance is
    # documented rather than tightened to exact-f32 level).
    fwd32 = jax.jit(functools.partial(overlap_patch_embed, compute_dtype=jnp.float32))
    out32 = jax.block_until_ready(fwd32(x, weight))
    assert jnp.allclose(out32, ref, atol=5e-2, rtol=5e-2)

    print("KERNEL_OK")
</pallas_src>

<mosaic_0001>
module attributes {stable_mosaic.version = 11 : i64} {
  func.func @_conv_as_matmul_kernel(%arg0: i32, %arg1: i32, %arg2: memref<1x36x256xbf16, #tpu.memory_space<vmem>>, %arg3: memref<32x36xbf16, #tpu.memory_space<vmem>>, %arg4: memref<1x32x256xf32, #tpu.memory_space<vmem>>) attributes {dimension_semantics = [#tpu.dimension_semantics<parallel>, #tpu.dimension_semantics<parallel>], iteration_bounds = array<i64: 2, 1>, scalar_prefetch = 0 : i64, scratch_operands = 0 : i64, tpu.core_type = #tpu.core_type<tc>, window_params = [{transform_indices = @transform_0, window_bounds = array<i64: 1, 36, 256>}, {pipeline_mode = #tpu.pipeline_mode<synchronous>, transform_indices = @transform_1, window_bounds = array<i64: 32, 36>}, {transform_indices = @transform_2, window_bounds = array<i64: 1, 32, 256>}]} {
    %c0 = arith.constant 0 : index
    %c0_0 = arith.constant 0 : index
    %0 = vector.load %arg3[%c0, %c0_0] : memref<32x36xbf16, #tpu.memory_space<vmem>>, vector<32x36xbf16>
    %c0_1 = arith.constant 0 : index
    %c0_2 = arith.constant 0 : index
    %c0_3 = arith.constant 0 : index
    %1 = vector.load %arg2[%c0_1, %c0_2, %c0_3] : memref<1x36x256xbf16, #tpu.memory_space<vmem>>, vector<1x36x256xbf16>
    %2 = vector.shape_cast %1 : vector<1x36x256xbf16> to vector<36x256xbf16>
    %cst = arith.constant dense<0.000000e+00> : vector<32x256xf32>
    %3 = tpu.matmul %0, %2, %cst {dimension_numbers = #tpu.dot_dimension_numbers<[1], [0], [0], [1], [0, 0, 1, 1], [], []>} : vector<32x36xbf16>, vector<36x256xbf16>, vector<32x256xf32> -> vector<32x256xf32>
    %c0_4 = arith.constant 0 : index
    %c0_5 = arith.constant 0 : index
    %c0_6 = arith.constant 0 : index
    %4 = vector.load %arg4[%c0_4, %c0_5, %c0_6] : memref<1x32x256xf32, #tpu.memory_space<vmem>>, vector<1x32x256xf32>
    %5 = vector.shape_cast %4 : vector<1x32x256xf32> to vector<32x256xf32>
    %6 = vector.shape_cast %3 : vector<32x256xf32> to vector<1x32x256xf32>
    tpu.vector_store %arg4[%c0_4, %c0_5, %c0_6], %6 {strides = array<i32>} : memref<1x32x256xf32, #tpu.memory_space<vmem>>, vector<1x32x256xf32>,
    return
  }
  func.func @transform_0(%arg0: i32, %arg1: i32) -> (i32, i32, i32) {
    %c0_i32 = arith.constant 0 : i32
    %c0_i32_0 = arith.constant 0 : i32
    return %arg0, %c0_i32, %arg1 : i32, i32, i32
  }
  func.func @transform_1(%arg0: i32, %arg1: i32) -> (i32, i32) {
    %c0_i32 = arith.constant 0 : i32
    %c0_i32_0 = arith.constant 0 : i32
    %c0_i32_1 = arith.constant 0 : i32
    return %c0_i32, %c0_i32_0 : i32, i32
  }
  func.func @transform_2(%arg0: i32, %arg1: i32) -> (i32, i32, i32) {
    %c0_i32 = arith.constant 0 : i32
    %c0_i32_0 = arith.constant 0 : i32
    return %arg0, %c0_i32, %arg1 : i32, i32, i32
  }
}

</mosaic_0001>

<bundles_post_ra>
// kernel: overlap_patch_embed.1
= control target key start
LH: loop header
LB: loop body
LE: loop exit
PB: predicated region body
PF: predicated region fallthrough
CT: control target
= control target key end

     0   :  { %s494_s9 = smov 0   ;;  %s496_s10 = smov 0   ;;  %s537_s0 = inlined_call_operand.vmem [shape: bf16[2,36,256], index: 0, kind: input, shape index: {}]   ;;  %s538_s1 = inlined_call_operand.vmem [shape: bf16[32,36], index: 1, kind: input, shape index: {}]   ;;  %s539_s2 = inlined_call_operand.vmem [shape: f32[2,32,256], index: 2, kind: output, shape index: {}]  }
   0x1   :  { %s498_s11 = smov 0  }
   0x2 LB: > { %s24_s12 = sadd.s32 1, %s472_s10  ;;  %p394_p0 = scmp.ge.s32.totalorder %s476_s11, 1  ;;  %s476_s11 = sphi %s498_s11, %s12_s11   ;;  %s472_s10 = sphi %s496_s10, %s541_s10   ;;  %s468_s9 = sphi %s494_s9, %s540_s9  }
   0x3   : > { %p26_p1 = scmp.ge.s32.totalorder %s24_s12, 2  ;;  %p133_p2 = scmp.lt.s32.totalorder %s476_s11, 3 }
   0x5   : > { %s543_s12 = smov (%p26_p1, %s24_s12), 0  ;;  %p134_p3 = pnand %p394_p0, %p133_p2 }
   0x6   : > { %p164_p4 = scmp.lt.s32.totalorder (!%p134_p3), %s468_s9, 1 }
   0x7   : > { %137 = sbr.rel (%p134_p3) target bundleno = 231 (0xe7), region = 28 }
   0xc   : > { %v478_v0 = vmov 0   ;;  %s545_s9 = smov (!%p164_p4, %s468_s9), 1  ;;  %vm235_vm0 = vcmask 1041408   ;;  %v452_v9 = vld [vmem:[%s538_s1] sm:$0xff]   ;;  %v453_v10 = vld [vmem:[%s538_s1 + $0x8] sm:$0xff]   ;;  %vm228_vm1 = vcmask 293888  }
   0xd   : > { %274 = vmatprep.mubr.bf16.mxu0 %v478_v0  ;;  %284 = vmatprep.mubr.bf16.mxu1 %v478_v0  ;;  %s418_s13 = smul.u32 40, %s545_s9  ;;  %s411_s21 = sshll.u32 %s545_s9, 6 }
   0xe   : > { %s181_s24 = scalar_lea.vmem %s539_s2, %s411_s21 }
   0xf   : > { %s171_s16 = scalar_lea.vmem %s537_s0, %s418_s13 }
  0x10   : > { %v192_v1 = vld [vmem:[%s171_s16 + $0x20] sm:$0x33]  ;;  %v446_v4 = vld [vmem:[%s171_s16 + $0x14] ss:$8 sps:$4 sm:$0xff]   ;;  %v448_v6 = vld [vmem:[%s171_s16 + $0x10] ss:$8 sps:$4 sm:$0xff]  }
  0x11   : > { %v405_v2 = vcombine.high %v192_v1, %v192_v1  ;;  %v404_v3 = vcombine.low %v192_v1, %v192_v1  ;;  %v449_v7 = vld [vmem:[%s171_s16 + $0x4] ss:$8 sps:$4 sm:$0xff]   ;;  %v451_v8 = vld [vmem:[%s171_s16] ss:$8 sps:$4 sm:$0xff]  }
  0x13   : > { %406 = vmatprep.subr.msk.bf16.mxu0 %vm235_vm0, %v405_v2  ;;  %412 = vmatprep.subr.msk.bf16.mxu1 %vm235_vm0, %v405_v2  ;;  %v237_v5 = vsel %vm235_vm0, %v404_v3, 0 }
  0x14   : > { %253 = vmatpush1.bf16.msra.mxu0 %v237_v5  ;;  %415 = vmatpush1.bf16.msra.mxu1 %v237_v5 }
  0x15   : > { %254 = vmatprep.subr.bf16.mxu0 %v446_v4  ;;  %413 = vmatprep.subr.bf16.mxu1 %v446_v4 }
  0x18   : > { %255 = vmatpush1.bf16.msra.mxu0 %v448_v6  ;;  %416 = vmatpush1.bf16.msra.mxu1 %v448_v6 }
  0x19   : > { %256 = vmatprep.subr.bf16.mxu0 %v449_v7  ;;  %414 = vmatprep.subr.bf16.mxu1 %v449_v7 }
  0x1c   : > { %257 = vmatpush1.bf16.msra.mxu0 %v451_v8  ;;  %417 = vmatpush1.bf16.msra.mxu1 %v451_v8 }
  0x1f   : > { %407 = vmatmul.mubr.msk.bf16.vlgmr.msra.gmra.mxu0 %vm228_vm1, %v452_v9  ;;  %408 = vmatmul.mubr.msk.bf16.vlgmr.msra.gmra.mxu1 %vm228_vm1, %v453_v10 }
  0xdf   : > { %v276_v11 = vpop.f32.mrf.mxu0  ;;  %v286_v12 = vpop.f32.mrf.mxu1 }
  0xe0   : > { %295 = vst [vmem:[%s181_s24] sm:$0xff] %v276_v11  ;;  %299 = vst [vmem:[%s181_s24 + $0x20] sm:$0xff] %v286_v12 }
  0xe1   : > { %v278_v13 = vpop.f32.mrf.mxu0  ;;  %v288_v14 = vpop.f32.mrf.mxu1 }
  0xe2   : > { %296 = vst [vmem:[%s181_s24 + $0x8] sm:$0xff] %v278_v13  ;;  %300 = vst [vmem:[%s181_s24 + $0x28] sm:$0xff] %v288_v14 }
  0xe3   : > { %v280_v15 = vpop.f32.mrf.mxu0  ;;  %v290_v16 = vpop.f32.mrf.mxu1 }
  0xe4   : > { %297 = vst [vmem:[%s181_s24 + $0x10] sm:$0xff] %v280_v15  ;;  %301 = vst [vmem:[%s181_s24 + $0x30] sm:$0xff] %v290_v16 }
  0xe5   : > { %v282_v17 = vpop.f32.mrf.mxu0  ;;  %v292_v18 = vpop.f32.mrf.mxu1 }
  0xe6   : > { %298 = vst [vmem:[%s181_s24 + $0x18] sm:$0xff] %v282_v17  ;;  %302 = vst [vmem:[%s181_s24 + $0x38] sm:$0xff] %v292_v18 }
  0xe7 PF: > { %s12_s11 = sadd.s32 1, %s476_s11   ;;  %s540_s9 = smov %s472_s10 }
  0xe8   : > { %p9_p5 = scmp.ge.s32.totalorder %s12_s11, 4   ;;  %s541_s10 = smov %s543_s12 }
  0xea   :  { %11 = sbr.rel (!%p9_p5) target bundleno = 2 (0x2), region = 58 }

</bundles_post_ra>
